<compile_context>
chip_gen: v5e
topology: v5e:2x2
jax: 0.10.0
libtpu: 0.0.40
codegen_flags: <defaults>
</compile_context>

<pallas_src>
import functools

import jax
import jax.numpy as jnp
from jax.experimental import pallas as pl
from jax.experimental.pallas import tpu as pltpu


def _round_up(x, m):
    return ((x + m - 1) // m) * m


def _vmem_budget_bytes():
    """Usable scoped-VMEM budget for this TPU generation (capacity minus headroom)."""
    try:
        cap = int(pltpu.get_tpu_info().vmem_capacity_bytes)
    except Exception:
        cap = 64 * 1024 * 1024          # conservative fallback: v7x per-TC VMEM
    return max(int(cap * 0.85), 32 * 1024 * 1024)


# ----------------------------------------------------------------------------
# Kernels
# ----------------------------------------------------------------------------
def _ffn_resident_kernel(x_ref, w1_ref, b1_ref, w2_ref, b2_ref, o_ref):
    """Whole FFN for one row tile; W1/W2/b1/b2 are VMEM-resident."""
    h = jnp.dot(x_ref[...], w1_ref[...], preferred_element_type=jnp.float32)
    h = jnp.maximum(h + b1_ref[...], 0.0)                    # bias + ReLU
    # Dropout: identity (eval/inference semantics).
    out = jnp.dot(h.astype(x_ref.dtype), w2_ref[...],
                  preferred_element_type=jnp.float32)
    o_ref[...] = (out + b2_ref[...]).astype(o_ref.dtype)


def _ffn_streamed_kernel(x_ref, w1_ref, b1_ref, w2_ref, b2_ref, o_ref, acc_ref,
                         *, tk):
    """One (row-tile, d_ff-slice) step; d_ff streamed as a reduction axis."""
    k = pl.program_id(1)
    start = pl.multiple_of(k * tk, tk)

    h = jnp.dot(x_ref[...], w1_ref[...], preferred_element_type=jnp.float32)
    h = jnp.maximum(h + b1_ref[:, pl.ds(start, tk)], 0.0)    # bias slice + ReLU
    # Dropout: identity (eval/inference semantics).
    contrib = jnp.dot(h.astype(x_ref.dtype), w2_ref[...],
                      preferred_element_type=jnp.float32)

    @pl.when(k == 0)
    def _():                              # write instead of zero-init + accumulate
        acc_ref[...] = contrib

    @pl.when(k > 0)
    def _():
        acc_ref[...] += contrib

    @pl.when(k == pl.num_programs(1) - 1)
    def _():
        o_ref[...] = (acc_ref[...] + b2_ref[...]).astype(o_ref.dtype)


# ----------------------------------------------------------------------------
# Tile / plan selection
# ----------------------------------------------------------------------------
def _tm_candidates(tm_max, pack):
    tm = tm_max
    while True:
        yield tm
        if tm <= pack:
            return
        tm = _round_up(max(pack, tm // 2), pack)


def _plan(M, d_model, d_ff, itemsize, tm_req, tk_req, budget, allow_resident):
    pack = max(8, 32 // itemsize)         # sublane pack: 8 f32, 16 bf16, 32 int8
    tm_max = max(pack, _round_up(min(tm_req, M), pack))

    # --- Plan A: weights fully VMEM-resident, 1-D grid over row tiles --------
    if allow_resident:
        w_bytes = 2 * 2 * d_model * d_ff * itemsize     # W1+W2 (double-buffer safe)
        bias_bytes = 2 * (d_ff + d_model) * itemsize
        for tm in _tm_candidates(tm_max, pack):
            need = (w_bytes + bias_bytes
                    + 4 * tm * d_model * itemsize       # x + out tiles, 2x buffered
                    + tm * d_ff * (4 + itemsize))       # f32 intermediate + cast copy
            if need <= budget:
                return dict(mode="resident", tm=tm)

    # --- Plan B: stream d_ff as a reduction axis ------------------------------
    if d_ff % 128 == 0:
        tk = min(_round_up(tk_req, 128), d_ff)
        while d_ff % tk:                  # pick a 128-multiple divisor of d_ff
            tk -= 128
        dff_pad = d_ff
    elif d_ff <= tk_req:
        tk, dff_pad = d_ff, d_ff          # single reduction step, no padding
    else:
        tk = _round_up(tk_req, 128)
        dff_pad = _round_up(d_ff, tk)     # zero-padding contributes 0 to output
    for tm in _tm_candidates(tm_max, pack):
        need = (2 * (2 * tm * d_model + 2 * d_model * tk) * itemsize   # x/out + W slices
                + (dff_pad + d_model) * itemsize                       # b1 + b2 resident
                + tm * d_model * 4                                     # f32 accumulator
                + tm * tk * (4 + itemsize))                            # intermediate
        if need <= budget:
            return dict(mode="streamed", tm=tm, tk=tk, dff_pad=dff_pad)

    raise ValueError(
        f"FeedForward tiles do not fit the VMEM budget ({budget} bytes); "
        f"reduce tm/tk or d_model/d_ff.")


# ----------------------------------------------------------------------------
# Public wrapper
# ----------------------------------------------------------------------------
@functools.partial(jax.jit, static_argnames=("tm", "tk", "force_streamed"))
def feed_forward(x, w1, b1, w2, b2, *, tm=1024, tk=512, force_streamed=False):
    """x: (B, S, d_model) -> (B, S, d_model).  Weights are (in, out)."""
    B, S, d_model = x.shape
    d_ff = w1.shape[1]
    M = B * S
    itemsize = jnp.dtype(x.dtype).itemsize

    budget = _vmem_budget_bytes()
    plan = _plan(M, d_model, d_ff, itemsize, tm, tk, budget,
                 allow_resident=not force_streamed)

    tm_eff = plan["tm"]
    M_pad = _round_up(M, tm_eff)
    grid_m = M_pad // tm_eff

    x2d = x.reshape(M, d_model)
    if M_pad != M:
        x2d = jnp.pad(x2d, ((0, M_pad - M), (0, 0)))
    b2_2d = b2.reshape(1, d_model)

    flops = 4 * M * d_model * d_ff        # two GEMMs, 2*M*K*N each

    # NOTE(perf): for best store throughput d_model should be a multiple of 128
    # (lane-dense out_spec); for inference, pass bf16 x/W1/W2 (accumulation
    # stays f32 via preferred_element_type).  Tiny demo shapes remain correct.

    if plan["mode"] == "resident":
        b1_2d = b1.reshape(1, d_ff)
        bytes_accessed = (x2d.size + w1.size + b1.size + w2.size + b2.size
                          + M_pad * d_model) * itemsize
        out2d = pl.pallas_call(
            _ffn_resident_kernel,
            out_shape=jax.ShapeDtypeStruct((M_pad, d_model), x.dtype),
            grid_spec=pltpu.PrefetchScalarGridSpec(
                num_scalar_prefetch=0,
                grid=(grid_m,),
                in_specs=[
                    pl.BlockSpec((tm_eff, d_model), lambda i: (i, 0)),   # x tile
                    pl.BlockSpec((d_model, d_ff), lambda i: (0, 0)),     # W1 resident
                    pl.BlockSpec((1, d_ff), lambda i: (0, 0)),           # b1 resident
                    pl.BlockSpec((d_ff, d_model), lambda i: (0, 0)),     # W2 resident
                    pl.BlockSpec((1, d_model), lambda i: (0, 0)),        # b2 resident
                ],
                out_specs=pl.BlockSpec((tm_eff, d_model), lambda i: (i, 0)),
            ),
            compiler_params=pltpu.CompilerParams(
                dimension_semantics=("parallel",),
                vmem_limit_bytes=budget,
            ),
            cost_estimate=pl.CostEstimate(
                flops=flops, transcendentals=0, bytes_accessed=bytes_accessed),
        )(x2d, w1, b1_2d, w2, b2_2d)
    else:
        tk_eff = plan["tk"]
        dff_pad = plan["dff_pad"]
        if dff_pad != d_ff:
            # TODO(synk): for serving, pre-pad weights once outside the jitted path.
            w1 = jnp.pad(w1, ((0, 0), (0, dff_pad - d_ff)))
            b1 = jnp.pad(b1, ((0, dff_pad - d_ff),))
            w2 = jnp.pad(w2, ((0, dff_pad - d_ff), (0, 0)))
        b1_2d = b1.reshape(1, dff_pad)
        grid = (grid_m, dff_pad // tk_eff)
        # Weights are re-streamed once per row tile -> account for it honestly.
        bytes_accessed = (x2d.size + b1_2d.size + b2.size + M_pad * d_model
                          + grid_m * (w1.size + w2.size)) * itemsize
        kernel = functools.partial(_ffn_streamed_kernel, tk=tk_eff)
        out2d = pl.pallas_call(
            kernel,
            out_shape=jax.ShapeDtypeStruct((M_pad, d_model), x.dtype),
            grid_spec=pltpu.PrefetchScalarGridSpec(
                num_scalar_prefetch=0,
                grid=grid,
                in_specs=[
                    pl.BlockSpec((tm_eff, d_model), lambda i, k: (i, 0)),   # x tile
                    pl.BlockSpec((d_model, tk_eff), lambda i, k: (0, k)),   # W1 slice
                    pl.BlockSpec((1, dff_pad), lambda i, k: (0, 0)),        # b1 resident
                    pl.BlockSpec((tk_eff, d_model), lambda i, k: (k, 0)),   # W2 slice
                    pl.BlockSpec((1, d_model), lambda i, k: (0, 0)),        # b2 resident
                ],
                out_specs=pl.BlockSpec((tm_eff, d_model), lambda i, k: (i, 0)),
                scratch_shapes=[pltpu.VMEM((tm_eff, d_model), jnp.float32)],
            ),
            compiler_params=pltpu.CompilerParams(
                dimension_semantics=("parallel", "arbitrary"),
                vmem_limit_bytes=budget,
            ),
            cost_estimate=pl.CostEstimate(
                flops=flops, transcendentals=0, bytes_accessed=bytes_accessed),
        )(x2d, w1, b1_2d, w2, b2_2d)

    if M_pad != M:
        out2d = out2d[:M]
    return out2d.reshape(B, S, d_model)


def _reference(x, w1, b1, w2, b2):
    h = jnp.maximum(jnp.dot(x, w1) + b1, 0.0)
    return jnp.dot(h, w2) + b2


def _make_params(key, d_model, d_ff, B, S):
    kx, kw1, kb1, kw2, kb2 = jax.random.split(key, 5)
    bound1 = 1.0 / (d_model ** 0.5)
    bound2 = 1.0 / (d_ff ** 0.5)
    x = jax.random.normal(kx, (B, S, d_model), dtype=jnp.float32)
    w1 = jax.random.uniform(kw1, (d_model, d_ff), jnp.float32, -bound1, bound1)
    b1 = jax.random.uniform(kb1, (d_ff,), jnp.float32, -bound1, bound1)
    w2 = jax.random.uniform(kw2, (d_ff, d_model), jnp.float32, -bound2, bound2)
    b2 = jax.random.uniform(kb2, (d_model,), jnp.float32, -bound2, bound2)
    return x, w1, b1, w2, b2


if __name__ == "__main__":
    key = jax.random.PRNGKey(0)
    k_a, k_b = jax.random.split(key)

    # 1) Small shapes consistent with the module's forward -> resident-weights plan.
    B, S, d_model, d_ff = 2, 8, 32, 64
    x, w1, b1, w2, b2 = _make_params(k_a, d_model, d_ff, B, S)
    out = jax.block_until_ready(feed_forward(x, w1, b1, w2, b2))
    ref = _reference(x, w1, b1, w2, b2)
    assert out.shape == (B, S, d_model)
    assert jnp.allclose(out, ref, atol=1e-5, rtol=1e-5), "resident-plan mismatch"

    # 2) Exercise the streamed (d_ff reduction) plan as well.
    B2, S2, dm2, dff2 = 2, 64, 128, 256
    x2, w1b, b1b, w2b, b2b = _make_params(k_b, dm2, dff2, B2, S2)
    out2 = jax.block_until_ready(
        feed_forward(x2, w1b, b1b, w2b, b2b, tm=64, tk=128, force_streamed=True))
    ref2 = _reference(x2, w1b, b1b, w2b, b2b)
    assert out2.shape == (B2, S2, dm2)
    assert jnp.allclose(out2, ref2, atol=1e-5, rtol=1e-5), "streamed-plan mismatch"

    print("KERNEL_OK")
</pallas_src>

<mosaic_0001>
module attributes {stable_mosaic.version = 11 : i64} {
  func.func @_ffn_resident_kernel(%arg0: i32, %arg1: memref<16x32xf32, #tpu.memory_space<vmem>>, %arg2: memref<32x64xf32, #tpu.memory_space<vmem>>, %arg3: memref<1x64xf32, #tpu.memory_space<vmem>>, %arg4: memref<64x32xf32, #tpu.memory_space<vmem>>, %arg5: memref<1x32xf32, #tpu.memory_space<vmem>>, %arg6: memref<16x32xf32, #tpu.memory_space<vmem>>) attributes {dimension_semantics = [#tpu.dimension_semantics<parallel>], iteration_bounds = array<i64: 1>, scalar_prefetch = 0 : i64, scratch_operands = 0 : i64, tpu.core_type = #tpu.core_type<tc>, window_params = [{transform_indices = @transform_0, window_bounds = array<i64: 16, 32>}, {pipeline_mode = #tpu.pipeline_mode<synchronous>, transform_indices = @transform_1, window_bounds = array<i64: 32, 64>}, {pipeline_mode = #tpu.pipeline_mode<synchronous>, transform_indices = @transform_2, window_bounds = array<i64: 1, 64>}, {pipeline_mode = #tpu.pipeline_mode<synchronous>, transform_indices = @transform_3, window_bounds = array<i64: 64, 32>}, {pipeline_mode = #tpu.pipeline_mode<synchronous>, transform_indices = @transform_4, window_bounds = array<i64: 1, 32>}, {transform_indices = @transform_5, window_bounds = array<i64: 16, 32>}]} {
    %c0 = arith.constant 0 : index
    %c0_0 = arith.constant 0 : index
    %0 = vector.load %arg1[%c0, %c0_0] : memref<16x32xf32, #tpu.memory_space<vmem>>, vector<16x32xf32>
    %c0_1 = arith.constant 0 : index
    %c0_2 = arith.constant 0 : index
    %1 = vector.load %arg2[%c0_1, %c0_2] : memref<32x64xf32, #tpu.memory_space<vmem>>, vector<32x64xf32>
    %cst = arith.constant dense<0.000000e+00> : vector<16x64xf32>
    %2 = tpu.matmul %0, %1, %cst {dimension_numbers = #tpu.dot_dimension_numbers<[1], [0], [0], [1], [0, 0, 1, 1], [], []>} : vector<16x32xf32>, vector<32x64xf32>, vector<16x64xf32> -> vector<16x64xf32>
    %c0_3 = arith.constant 0 : index
    %c0_4 = arith.constant 0 : index
    %3 = vector.load %arg3[%c0_3, %c0_4] : memref<1x64xf32, #tpu.memory_space<vmem>>, vector<1x64xf32>
    %4 = vector.broadcast %3 : vector<1x64xf32> to vector<16x64xf32>
    %5 = arith.addf %2, %4 : vector<16x64xf32>
    %cst_5 = arith.constant 0.000000e+00 : f32
    %6 = vector.broadcast %cst_5 : f32 to vector<16x64xf32>
    %7 = arith.maximumf %5, %6 : vector<16x64xf32>
    %c0_6 = arith.constant 0 : index
    %c0_7 = arith.constant 0 : index
    %8 = vector.load %arg4[%c0_6, %c0_7] : memref<64x32xf32, #tpu.memory_space<vmem>>, vector<64x32xf32>
    %cst_8 = arith.constant dense<0.000000e+00> : vector<16x32xf32>
    %9 = tpu.matmul %7, %8, %cst_8 {dimension_numbers = #tpu.dot_dimension_numbers<[1], [0], [0], [1], [0, 0, 1, 1], [], []>} : vector<16x64xf32>, vector<64x32xf32>, vector<16x32xf32> -> vector<16x32xf32>
    %c0_9 = arith.constant 0 : index
    %c0_10 = arith.constant 0 : index
    %10 = vector.load %arg5[%c0_9, %c0_10] : memref<1x32xf32, #tpu.memory_space<vmem>>, vector<1x32xf32>
    %11 = vector.broadcast %10 : vector<1x32xf32> to vector<16x32xf32>
    %12 = arith.addf %9, %11 : vector<16x32xf32>
    %c0_11 = arith.constant 0 : index
    %c0_12 = arith.constant 0 : index
    %13 = vector.load %arg6[%c0_11, %c0_12] : memref<16x32xf32, #tpu.memory_space<vmem>>, vector<16x32xf32>
    tpu.vector_store %arg6[%c0_11, %c0_12], %12 {strides = array<i32>} : memref<16x32xf32, #tpu.memory_space<vmem>>, vector<16x32xf32>,
    return
  }
  func.func @transform_0(%arg0: i32) -> (i32, i32) {
    %c0_i32 = arith.constant 0 : i32
    %c0_i32_0 = arith.constant 0 : i32
    return %arg0, %c0_i32 : i32, i32
  }
  func.func @transform_1(%arg0: i32) -> (i32, i32) {
    %c0_i32 = arith.constant 0 : i32
    %c0_i32_0 = arith.constant 0 : i32
    %c0_i32_1 = arith.constant 0 : i32
    return %c0_i32, %c0_i32_0 : i32, i32
  }
  func.func @transform_2(%arg0: i32) -> (i32, i32) {
    %c0_i32 = arith.constant 0 : i32
    %c0_i32_0 = arith.constant 0 : i32
    %c0_i32_1 = arith.constant 0 : i32
    return %c0_i32, %c0_i32_0 : i32, i32
  }
  func.func @transform_3(%arg0: i32) -> (i32, i32) {
    %c0_i32 = arith.constant 0 : i32
    %c0_i32_0 = arith.constant 0 : i32
    %c0_i32_1 = arith.constant 0 : i32
    return %c0_i32, %c0_i32_0 : i32, i32
  }
  func.func @transform_4(%arg0: i32) -> (i32, i32) {
    %c0_i32 = arith.constant 0 : i32
    %c0_i32_0 = arith.constant 0 : i32
    %c0_i32_1 = arith.constant 0 : i32
    return %c0_i32, %c0_i32_0 : i32, i32
  }
  func.func @transform_5(%arg0: i32) -> (i32, i32) {
    %c0_i32 = arith.constant 0 : i32
    %c0_i32_0 = arith.constant 0 : i32
    return %arg0, %c0_i32 : i32, i32
  }
}

</mosaic_0001>

<bundles_post_ra>
// kernel: feed_forward.1
= control target key start
LH: loop header
LB: loop body
LE: loop exit
PB: predicated region body
PF: predicated region fallthrough
CT: control target
= control target key end

     0   :  { %s260_s0 = inlined_call_operand.vmem [shape: f32[16,32], index: 0, kind: input, shape index: {}]   ;;  %s261_s1 = inlined_call_operand.vmem [shape: f32[32,64], index: 1, kind: input, shape index: {}]   ;;  %s262_s2 = inlined_call_operand.vmem [shape: f32[1,64], index: 2, kind: input, shape index: {}]   ;;  %s263_s3 = inlined_call_operand.vmem [shape: f32[64,32], index: 3, kind: input, shape index: {}]   ;;  %s264_s4 = inlined_call_operand.vmem [shape: f32[1,32], index: 4, kind: input, shape index: {}]   ;;  %s265_s5 = inlined_call_operand.hbm [shape: f32[16,32], index: 5, kind: output, shape index: {}]  }
   0x1   :  { %v26_v0 = vld [vmem:[%s261_s1 + $0x18] sm:$0xff]  ;;  %v25_v1 = vld [vmem:[%s261_s1 + $0x10] sm:$0xff]  ;;  %v24_v2 = vld [vmem:[%s261_s1 + $0x8] sm:$0xff] }
   0x2   :  { %129 = vmatpush.msra.mxu3 %v26_v0  ;;  %50 = vmatpush.msra.mxu0 %v26_v0  ;;  %v70_v3 = vld [vmem:[%s263_s3 + $0x38] sm:$0xff]  ;;  %v69_v4 = vld [vmem:[%s263_s3 + $0x30] sm:$0xff]  ;;  %v23_v5 = vld [vmem:[%s261_s1] sm:$0xff] }
   0x3   :  { %133 = vmatpush.msra.mxu2 %v70_v3  ;;  %90 = vmatpush.msra.mxu1 %v70_v3 }
   0x4   :  { %130 = vmatpush.msra.mxu3 %v25_v1  ;;  %51 = vmatpush.msra.mxu0 %v25_v1 }
   0x5   :  { %10 = vsyncpa [#allocation3], 0  ;;  %v22_v6 = vld [vmem:[%s260_s0 + $0x8] sm:$0xff]  ;;  %vm31_vm0 = vcmask 261120   ;;  %v21_v7 = vld [vmem:[%s260_s0] sm:$0xff]  ;;  %134 = vmatpush.msra.mxu2 %v69_v4  ;;  %91 = vmatpush.msra.mxu1 %v69_v4  ;;  %vm75_vm1 = vcmask 523264  }
   0x6   :  { %131 = vmatpush.msra.mxu3 %v24_v2  ;;  %52 = vmatpush.msra.mxu0 %v24_v2  ;;  %v68_v8 = vld [vmem:[%s263_s3 + $0x28] sm:$0xff]  ;;  %v67_v9 = vld [vmem:[%s263_s3 + $0x20] sm:$0xff]  ;;  %v66_v10 = vld [vmem:[%s263_s3 + $0x18] sm:$0xff]  ;;  %s113_s25 = sshll.u32 %s265_s5, 4  ;;  %s173_s26 = smov 128   ;;  %s114_s25 = int_to_ptr.hbm [resolvable:$true] %s113_s25 }
   0x7   :  { %135 = vmatpush.msra.mxu2 %v68_v8  ;;  %92 = vmatpush.msra.mxu1 %v68_v8  ;;  %v65_v11 = vld [vmem:[%s263_s3 + $0x10] sm:$0xff]  ;;  %v64_v12 = vld [vmem:[%s263_s3 + $0x8] sm:$0xff]  ;;  %v63_v13 = vld [vmem:[%s263_s3] sm:$0xff]  ;;  %s172_s3 = smov [#allocation2]   ;;  %s174_s27 = smov 8  }
   0x8   :  { %132 = vmatpush.msra.mxu3 %v23_v5  ;;  %53 = vmatpush.msra.mxu0 %v23_v5  ;;  %v144_v14 = vld [vmem:[%s262_s2] ss:$0 sm:$0xff]  ;;  %s111_s23 = sshll.u32 %s172_s3, 4  ;;  %s112_s23 = int_to_ptr.vmem [resolvable:$true] %s111_s23 }
   0x9   :  { %126 = vmatmul.msk.f32.vlgmr.msra.gmra.mxu3 %vm31_vm0, %v22_v6  ;;  %125 = vmatmul.msk.f32.vlgmr.msra.gmra.mxu0 %vm31_vm0, %v21_v7  ;;  %v145_v21 = vld [vmem:[%s264_s4] ss:$0 sm:$0xff] }
   0xa   :  { %136 = vmatpush.msra.mxu2 %v67_v9  ;;  %93 = vmatpush.msra.mxu1 %v67_v9 }
   0xc   :  { %137 = vmatpush.msra.mxu2 %v66_v10  ;;  %94 = vmatpush.msra.mxu1 %v66_v10 }
   0xe   :  { %138 = vmatpush.msra.mxu2 %v65_v11  ;;  %95 = vmatpush.msra.mxu1 %v65_v11 }
  0x10   :  { %139 = vmatpush.msra.mxu2 %v64_v12  ;;  %96 = vmatpush.msra.mxu1 %v64_v12 }
  0x12   :  { %140 = vmatpush.msra.mxu2 %v63_v13  ;;  %97 = vmatpush.msra.mxu1 %v63_v13 }
  0x86   :  { %v55_v15 = vpop.f32.mrf.mxu0 }
  0x87   :  { %v56_v16 = vadd.f32 %v144_v14, %v55_v15 }
  0x89   :  { %v61_v17 = vmax.f32 %v56_v16, 0.0 }
  0x8b   :  { %127 = vmatmul.msk.f32.vlgmr.msra.gmra.mxu1 %vm75_vm1, %v61_v17 }
  0x8c   :  { %v58_v18 = vpop.f32.mrf.mxu3 }
  0x8d   :  { %v59_v19 = vadd.f32 %v144_v14, %v58_v18 }
  0x8f   :  { %v62_v20 = vmax.f32 %v59_v19, 0.0 }
  0x91   :  { %128 = vmatmul.msk.f32.vlgmr.msra.gmra.mxu2 %vm75_vm1, %v62_v20 }
 0x108   :  { %v99_v22 = vpop.f32.mrf.mxu1 }
 0x109   :  { %v100_v23 = vadd.f32 %v145_v21, %v99_v22 }
 0x10b   :  { %105 = vst.msk [vmem:[#allocation2] sm:$0xff] %vm31_vm0, %v100_v23 }
 0x114   :  { %v102_v24 = vpop.f32.mrf.mxu2 }
 0x115   :  { %v103_v25 = vadd.f32 %v145_v21, %v102_v24 }
 0x117   :  { %106 = vst.msk [vmem:[#allocation2 + $0x8] sm:$0xff] %vm31_vm0, %v103_v25 }
 0x118   :  { %119 = dma.vmem_to_hbm [thread:$0]  %s112_s23, 256, %s114_s25, [#allocation3], %s173_s26, %s173_s26, %s174_s27  }
 0x119   :  { %170 = dma.done.wait [#allocation3], 256  }
 0x11a   :  { %171 = vsyncadd [#allocation3], 4294967040 }
 0x11b   :  { %124 = vsyncpa [#allocation3], 1 }

</bundles_post_ra>
